<compile_context>
chip_gen: v6e
topology: v6e:2x2x1
jax: 0.10.0
libtpu: 0.0.40
codegen_flags: <defaults>
</compile_context>

<pallas_src>
import functools

import jax
import jax.numpy as jnp
from jax import lax
from jax.experimental import pallas as pl
from jax.experimental.pallas import tpu as pltpu

_EPS = 1e-12          # F.normalize default eps
_EPS2 = _EPS * _EPS   # applied to the squared norm (sqrt is monotone -> identical clamp)
_SUBLANE = 8
_LANE = 128


def _cdiv(a, b):
    return -(-a // b)


def _round_up(x, m):
    return _cdiv(x, m) * m


def _tpu_defaults():
    """(num_tensorcores, vmem_limit_bytes) with safe fallbacks if introspection fails."""
    n_cores = 1
    vmem_cap = 128 * 1024 * 1024
    try:
        info = pltpu.get_tpu_info()
        cap = getattr(info, "vmem_capacity_bytes", None)
        if isinstance(cap, int) and cap > 0:
            vmem_cap = cap
        for name in ("num_cores", "core_count", "num_tensorcores",
                     "tensor_core_count", "cores_per_chip"):
            v = getattr(info, name, None)
            if isinstance(v, int) and 1 <= v <= 8:
                n_cores = v
                break
    except Exception:
        pass
    # Scoped VMEM limit: half of physical, capped at 64 MiB (=> 32 MiB on v7x's 64 MiB/TC,
    # 64 MiB on v5e/v6e's 128 MiB).
    vmem_limit = min(vmem_cap // 2, 64 * 1024 * 1024)
    return n_cores, vmem_limit


def _pick_tiling(B, D, itemsize, *, vmem_budget_bytes, max_tb, n_cores):
    """Pick (n_splits, steps, tb); tb is always a multiple of 8."""
    # Per tile row: 2 streamed inputs x 2 pipeline buffers (input dtype) + ~4 f32-width
    # temporaries for the fused products/reductions (post cosine-identity rewrite).
    bytes_per_row = D * (2 * 2 * itemsize + 4 * 4)
    tb_cap = (vmem_budget_bytes // bytes_per_row) // _SUBLANE * _SUBLANE
    tb_cap = max(_SUBLANE, min(tb_cap, _round_up(max_tb, _SUBLANE)))

    # One partial per TensorCore (2 on v7x via CORE_PARALLEL); no split on 1-TC chips.
    n_splits = n_cores if (n_cores > 1 and B >= 2 * _SUBLANE) else 1
    rows_per_split = _round_up(_cdiv(B, n_splits), _SUBLANE)

    tb = min(tb_cap, rows_per_split)               # largest tile within budget
    steps = _cdiv(rows_per_split, tb)              # ragged tail handled by in-kernel mask
    return n_splits, steps, tb


def _teacher_loss_kernel(*refs, gaussian: bool, steps: int, tb: int,
                         batch: int, inv_batch: float):
    if gaussian:
        conf_ref, feat_ref, teach_ref, out_ref, acc_ref = refs
    else:
        feat_ref, teach_ref, out_ref, acc_ref = refs
        conf_ref = None

    p = pl.program_id(0)                 # per-core split axis
    i = pl.program_id(1)                 # reduction (step) axis
    block_idx = p * steps + i            # logical (unclamped) block index
    row0 = block_idx * tb                # first global row covered by this grid cell

    @pl.when(i == 0)
    def _init():
        acc_ref[...] = jnp.zeros_like(acc_ref)

    f = feat_ref[...].astype(jnp.float32)
    t = teach_ref[...].astype(jnp.float32)

    # ||f_hat - t_hat||^2 = ff*inv_f^2 + tt*inv_t^2 - 2*ft*inv_f*inv_t  (cosine identity),
    # with inv_* = rsqrt(max(||.||^2, eps^2)) == F.normalize's max(||.||, eps) clamp.
    ff = jnp.sum(f * f, axis=-1, keepdims=True)
    tt = jnp.sum(t * t, axis=-1, keepdims=True)
    ft = jnp.sum(f * t, axis=-1, keepdims=True)

    inv_f = lax.rsqrt(jnp.maximum(ff, _EPS2))
    inv_t = lax.rsqrt(jnp.maximum(tt, _EPS2))

    row = (ff * (inv_f * inv_f) + tt * (inv_t * inv_t)
           - 2.0 * ft * (inv_f * inv_t))                       # (tb, 1) per-row MSE sums

    if gaussian:
        # confidence lives as one untiled VMEM block; slice the rows for this step.
        start = pl.multiple_of(row0, _SUBLANE)
        row = row * conf_ref[pl.ds(start, tb), :].astype(jnp.float32)

    # Mask rows past the true batch (ragged tail / duplicated clamped blocks) so garbage
    # or revisited data contributes exactly 0.  Mask the row *sums*, not the inputs.
    row_ids = lax.broadcasted_iota(jnp.int32, (tb, 1), 0) + row0
    row = jnp.where(row_ids < batch, row, 0.0)

    acc_ref[...] = acc_ref[...] + row                          # cheap (tb,1) accumulate

    @pl.when(i == steps - 1)
    def _finalize():
        total = jnp.sum(acc_ref[...]) * inv_batch              # single deferred reduce
        out_ref[...] = jnp.broadcast_to(total, out_ref.shape).astype(out_ref.dtype)


def teacher_loss(confidence, feature, teacher_feature, gaussian=False, *,
                 max_tb=1024, vmem_budget_bytes=None, vmem_limit_bytes=None,
                 n_cores=None):
    """Pallas implementation of TeacherLoss.forward.  Returns a scalar (f32)."""
    B, D = feature.shape
    assert teacher_feature.shape == (B, D)
    gaussian = bool(gaussian)

    detected_cores, detected_limit = _tpu_defaults()
    if n_cores is None:
        n_cores = detected_cores
    if vmem_limit_bytes is None:
        vmem_limit_bytes = detected_limit
    if vmem_budget_bytes is None:
        vmem_budget_bytes = (vmem_limit_bytes * 3) // 4        # headroom for out/scratch

    itemsize = jnp.dtype(feature.dtype).itemsize
    n_splits, steps, tb = _pick_tiling(
        B, D, itemsize, vmem_budget_bytes=vmem_budget_bytes,
        max_tb=max_tb, n_cores=n_cores)

    steps_total = _cdiv(B, tb)           # number of blocks that touch real rows
    last_block = steps_total - 1

    def row_map(p_, i_):
        # Clamp so no grid cell ever addresses a block that is fully out of bounds; the
        # in-kernel row mask (built from the *unclamped* index) zeroes its contribution.
        return (jnp.minimum(p_ * steps + i_, last_block), 0)

    in_specs = []
    operands = []
    if gaussian:
        conf = jnp.asarray(confidence, jnp.float32).reshape(B, 1)
        conf_rows = n_splits * steps * tb
        if conf_rows != B:               # tiny (B,1) pad only; (B,D) inputs never padded
            conf = jnp.pad(conf, ((0, conf_rows - B), (0, 0)))
        in_specs.append(pl.BlockSpec((conf_rows, 1), lambda p_, i_: (0, 0)))
        operands.append(conf)
    in_specs += [
        pl.BlockSpec((tb, D), row_map),                        # feature
        pl.BlockSpec((tb, D), row_map),                        # teacher_feature
    ]
    operands += [feature, teacher_feature]

    kernel = functools.partial(_teacher_loss_kernel,
                               gaussian=gaussian, steps=steps, tb=tb,
                               batch=B, inv_batch=1.0 / float(B))

    if n_splits > 1 and hasattr(pltpu, "CORE_PARALLEL"):
        dim_sem = (pltpu.CORE_PARALLEL, pltpu.ARBITRARY)       # real 2-TC split on v7x
    elif n_splits > 1:
        dim_sem = ("parallel", "arbitrary")
    else:
        dim_sem = ("arbitrary", "arbitrary")

    out = pl.pallas_call(
        kernel,
        # One lane-dense partial slab per core split; summed in the wrapper.
        out_shape=jax.ShapeDtypeStruct((n_splits, _SUBLANE, _LANE), jnp.float32),
        grid_spec=pltpu.PrefetchScalarGridSpec(
            num_scalar_prefetch=0,
            grid=(n_splits, steps),
            in_specs=in_specs,
            out_specs=pl.BlockSpec((1, _SUBLANE, _LANE), lambda p_, i_: (p_, 0, 0)),
            scratch_shapes=[pltpu.VMEM((tb, 1), jnp.float32)],  # per-row running sums
        ),
        compiler_params=pltpu.CompilerParams(
            dimension_semantics=dim_sem,
            vmem_limit_bytes=int(vmem_limit_bytes),
        ),
    )(*operands)

    return jnp.sum(out[:, 0, 0])


def _teacher_loss_ref(confidence, feature, teacher_feature, gaussian=False):
    """Pure-JAX reference mirroring the PyTorch module."""
    def _normalize(x):
        n = jnp.maximum(jnp.linalg.norm(x, axis=1, keepdims=True), _EPS)
        return x / n
    loss = (_normalize(feature) - _normalize(teacher_feature)) ** 2
    if gaussian:
        loss = loss * confidence
    return jnp.sum(loss) / feature.shape[0]


if __name__ == "__main__":
    key = jax.random.PRNGKey(0)

    def run_case(B, D, gaussian, **kw):
        k1, k2, k3 = jax.random.split(jax.random.fold_in(key, B * 1000 + D), 3)
        feature = jax.random.normal(k1, (B, D), dtype=jnp.float32)
        teacher = jax.random.normal(k2, (B, D), dtype=jnp.float32)
        conf = jax.nn.sigmoid(jax.random.normal(k3, (B, 1), dtype=jnp.float32))

        out = jax.block_until_ready(
            teacher_loss(conf, feature, teacher, gaussian=gaussian, **kw))
        ref = _teacher_loss_ref(conf, feature, teacher, gaussian=gaussian)
        assert jnp.allclose(out, ref, rtol=5e-5, atol=5e-5), (B, D, gaussian,
                                                              float(out), float(ref))

    for g in (False, True):
        run_case(16, 256, g)               # full tile (split across TCs if >1 core)
        run_case(12, 128, g)               # ragged batch -> in-kernel tail mask
        run_case(50, 384, g, max_tb=16)    # multi-step accumulation + partial last tile
        run_case(64, 128, g, max_tb=8)     # forced small-tile multi-step path

    print("KERNEL_OK")
</pallas_src>

<mosaic_0001>
module attributes {stable_mosaic.version = 11 : i64} {
  func.func @_teacher_loss_kernel(%arg0: i32, %arg1: i32, %arg2: memref<16x256xf32, #tpu.memory_space<vmem>>, %arg3: memref<16x256xf32, #tpu.memory_space<vmem>>, %arg4: memref<1x8x128xf32, #tpu.memory_space<vmem>>, %arg5: memref<16x1xf32, #tpu.memory_space<vmem>>) attributes {dimension_semantics = [#tpu.dimension_semantics<arbitrary>, #tpu.dimension_semantics<arbitrary>], iteration_bounds = array<i64: 1, 1>, scalar_prefetch = 0 : i64, scratch_operands = 1 : i64, tpu.core_type = #tpu.core_type<tc>, window_params = [{transform_indices = @transform_0, window_bounds = array<i64: 16, 256>}, {transform_indices = @transform_1, window_bounds = array<i64: 16, 256>}, {transform_indices = @transform_2, window_bounds = array<i64: 1, 8, 128>}]} {
    %c1_i32 = arith.constant 1 : i32
    %0 = arith.muli %arg0, %c1_i32 : i32
    %1 = arith.addi %0, %arg1 : i32
    %c16_i32 = arith.constant 16 : i32
    %2 = arith.muli %1, %c16_i32 : i32
    %c0_i32 = arith.constant 0 : i32
    %3 = arith.cmpi eq, %arg1, %c0_i32 : i32
    %4 = arith.extui %3 : i1 to i32
    %c0_i32_0 = arith.constant 0 : i32
    %5 = arith.cmpi ne, %4, %c0_i32_0 : i32
    scf.if %5 {
      %cst_17 = arith.constant 0.000000e+00 : f32
      %46 = vector.broadcast %cst_17 : f32 to vector<16x1xf32>
      %c0_18 = arith.constant 0 : index
      %c0_19 = arith.constant 0 : index
      %47 = vector.load %arg5[%c0_18, %c0_19] : memref<16x1xf32, #tpu.memory_space<vmem>>, vector<16x1xf32>
      tpu.vector_store %arg5[%c0_18, %c0_19], %46 {strides = array<i32>} : memref<16x1xf32, #tpu.memory_space<vmem>>, vector<16x1xf32>,
    } else {
    }
    %c0 = arith.constant 0 : index
    %c0_1 = arith.constant 0 : index
    %6 = vector.load %arg2[%c0, %c0_1] : memref<16x256xf32, #tpu.memory_space<vmem>>, vector<16x256xf32>
    %c0_2 = arith.constant 0 : index
    %c0_3 = arith.constant 0 : index
    %7 = vector.load %arg3[%c0_2, %c0_3] : memref<16x256xf32, #tpu.memory_space<vmem>>, vector<16x256xf32>
    %8 = arith.mulf %6, %6 : vector<16x256xf32>
    %cst = arith.constant dense<0.000000e+00> : vector<16xf32>
    %9 = vector.multi_reduction <add>, %8, %cst [1] : vector<16x256xf32> to vector<16xf32>
    %10 = vector.shape_cast %9 : vector<16xf32> to vector<16x1xf32>
    %11 = arith.mulf %7, %7 : vector<16x256xf32>
    %cst_4 = arith.constant dense<0.000000e+00> : vector<16xf32>
    %12 = vector.multi_reduction <add>, %11, %cst_4 [1] : vector<16x256xf32> to vector<16xf32>
    %13 = vector.shape_cast %12 : vector<16xf32> to vector<16x1xf32>
    %14 = arith.mulf %6, %7 : vector<16x256xf32>
    %cst_5 = arith.constant dense<0.000000e+00> : vector<16xf32>
    %15 = vector.multi_reduction <add>, %14, %cst_5 [1] : vector<16x256xf32> to vector<16xf32>
    %16 = vector.shape_cast %15 : vector<16xf32> to vector<16x1xf32>
    %cst_6 = arith.constant 1.000000e-24 : f32
    %17 = vector.broadcast %cst_6 : f32 to vector<16x1xf32>
    %18 = arith.maximumf %10, %17 : vector<16x1xf32>
    %19 = math.rsqrt %18 : vector<16x1xf32>
    %cst_7 = arith.constant 1.000000e-24 : f32
    %20 = vector.broadcast %cst_7 : f32 to vector<16x1xf32>
    %21 = arith.maximumf %13, %20 : vector<16x1xf32>
    %22 = math.rsqrt %21 : vector<16x1xf32>
    %23 = arith.mulf %19, %19 : vector<16x1xf32>
    %24 = arith.mulf %10, %23 : vector<16x1xf32>
    %25 = arith.mulf %22, %22 : vector<16x1xf32>
    %26 = arith.mulf %13, %25 : vector<16x1xf32>
    %27 = arith.addf %24, %26 : vector<16x1xf32>
    %cst_8 = arith.constant 2.000000e+00 : f32
    %28 = vector.broadcast %cst_8 : f32 to vector<16x1xf32>
    %29 = arith.mulf %28, %16 : vector<16x1xf32>
    %30 = arith.mulf %19, %22 : vector<16x1xf32>
    %31 = arith.mulf %29, %30 : vector<16x1xf32>
    %32 = arith.subf %27, %31 : vector<16x1xf32>
    %33 = tpu.iota {dimensions = array<i32: 0>} : vector<16x1xi32>
    %34 = vector.broadcast %2 : i32 to vector<16x1xi32>
    %35 = arith.addi %33, %34 : vector<16x1xi32>
    %c16_i32_9 = arith.constant 16 : i32
    %36 = vector.broadcast %c16_i32_9 : i32 to vector<16x1xi32>
    %37 = arith.cmpi slt, %35, %36 : vector<16x1xi32>
    %cst_10 = arith.constant 0.000000e+00 : f32
    %38 = vector.broadcast %cst_10 : f32 to vector<16x1xf32>
    %39 = arith.select %37, %32, %38 : vector<16x1xi1>, vector<16x1xf32>
    %c0_11 = arith.constant 0 : index
    %c0_12 = arith.constant 0 : index
    %40 = vector.load %arg5[%c0_11, %c0_12] : memref<16x1xf32, #tpu.memory_space<vmem>>, vector<16x1xf32>
    %41 = arith.addf %40, %39 : vector<16x1xf32>
    %c0_13 = arith.constant 0 : index
    %c0_14 = arith.constant 0 : index
    %42 = vector.load %arg5[%c0_13, %c0_14] : memref<16x1xf32, #tpu.memory_space<vmem>>, vector<16x1xf32>
    tpu.vector_store %arg5[%c0_13, %c0_14], %41 {strides = array<i32>} : memref<16x1xf32, #tpu.memory_space<vmem>>, vector<16x1xf32>,
    %c0_i32_15 = arith.constant 0 : i32
    %43 = arith.cmpi eq, %arg1, %c0_i32_15 : i32
    %44 = arith.extui %43 : i1 to i32
    %c0_i32_16 = arith.constant 0 : i32
    %45 = arith.cmpi ne, %44, %c0_i32_16 : i32
    scf.if %45 {
      %c0_17 = arith.constant 0 : index
      %c0_18 = arith.constant 0 : index
      %46 = vector.load %arg5[%c0_17, %c0_18] : memref<16x1xf32, #tpu.memory_space<vmem>>, vector<16x1xf32>
      %47 = vector.shape_cast %46 : vector<16x1xf32> to vector<1x16x1xf32>
      %cst_19 = arith.constant dense<0.000000e+00> : vector<1xf32>
      %48 = vector.multi_reduction <add>, %47, %cst_19 [1, 2] : vector<1x16x1xf32> to vector<1xf32>
      %49 = vector.shape_cast %48 : vector<1xf32> to vector<1x1x1xf32>
      %50 = vector.extract %49[0, 0, 0] : f32 from vector<1x1x1xf32>
      %cst_20 = arith.constant 6.250000e-02 : f32
      %51 = arith.mulf %50, %cst_20 : f32
      %52 = vector.broadcast %51 : f32 to vector<1x8x128xf32>
      %c0_21 = arith.constant 0 : index
      %c0_22 = arith.constant 0 : index
      %c0_23 = arith.constant 0 : index
      %53 = vector.load %arg4[%c0_21, %c0_22, %c0_23] : memref<1x8x128xf32, #tpu.memory_space<vmem>>, vector<1x8x128xf32>
      tpu.vector_store %arg4[%c0_21, %c0_22, %c0_23], %52 {strides = array<i32>} : memref<1x8x128xf32, #tpu.memory_space<vmem>>, vector<1x8x128xf32>,
    } else {
    }
    return
  }
  func.func @transform_0(%arg0: i32, %arg1: i32) -> (i32, i32) {
    %c1_i32 = arith.constant 1 : i32
    %0 = arith.muli %arg0, %c1_i32 : i32
    %1 = arith.addi %0, %arg1 : i32
    %c0_i32 = arith.constant 0 : i32
    %2 = arith.minsi %1, %c0_i32 : i32
    %c0_i32_0 = arith.constant 0 : i32
    %c0_i32_1 = arith.constant 0 : i32
    return %2, %c0_i32_0 : i32, i32
  }
  func.func @transform_1(%arg0: i32, %arg1: i32) -> (i32, i32) {
    %c1_i32 = arith.constant 1 : i32
    %0 = arith.muli %arg0, %c1_i32 : i32
    %1 = arith.addi %0, %arg1 : i32
    %c0_i32 = arith.constant 0 : i32
    %2 = arith.minsi %1, %c0_i32 : i32
    %c0_i32_0 = arith.constant 0 : i32
    %c0_i32_1 = arith.constant 0 : i32
    return %2, %c0_i32_0 : i32, i32
  }
  func.func @transform_2(%arg0: i32, %arg1: i32) -> (i32, i32, i32) {
    %c0_i32 = arith.constant 0 : i32
    %c0_i32_0 = arith.constant 0 : i32
    %c0_i32_1 = arith.constant 0 : i32
    return %arg0, %c0_i32, %c0_i32_0 : i32, i32, i32
  }
}

</mosaic_0001>

<bundles_post_ra>
// kernel: tpu_custom_call.1
= control target key start
LH: loop header
LB: loop body
LE: loop exit
PB: predicated region body
PF: predicated region fallthrough
CT: control target
= control target key end

     0   :  { %7 = vsyncpa [#allocation4], 0  ;;  %s310_s0 = inlined_call_operand.hbm [shape: f32[16,256], index: 0, kind: input, shape index: {}]   ;;  %s311_s1 = inlined_call_operand.hbm [shape: f32[16,256], index: 1, kind: input, shape index: {}]   ;;  %s312_s2 = inlined_call_operand.hbm [shape: f32[1,8,128], index: 2, kind: output, shape index: {}]  }
   0x1   :  { %8 = vsyncpa [#allocation7], 0 }
   0x2   :  { %9 = vsyncpa [#allocation5], 0  ;;  %s274_s9 = smov [#allocation3]  }
   0x3   :  { %s22_s10 = sshll.u32 %s274_s9, 4  ;;  %s23_s10 = int_to_ptr.vmem [resolvable:$true] %s22_s10 }
   0x4   :  { %s216_s11 = scalar_lea.vmem %s23_s10, 512  ;;  %p221_p1 = scmp.lt.s32.totalorder %s23_s10, %s23_s10 }
   0x5   :  { %p217_p0 = scmp.ne.s32.totalorder %s23_s10, %s216_s11  ;;  %p222_p2 = scmp.lt.s32.totalorder %s216_s11, %s216_s11 }
   0x7   :  { %p223_p3 = por %p222_p2, %p221_p1 }
   0x9   :  { %p224_p4 = pnand %p223_p3, %p217_p0 }
   0xb   :  { %227 = shalt.err (!%p224_p4)
}
   0xc   :  { %s275_s12 = smov 256   ;;  %s276_s13 = smov 16  }
   0xd   :  { %28 = dma.hbm_to_vmem [thread:$0]  %s310_s0, 512, %s23_s10, [#allocation4], %s275_s12, %s275_s12, %s276_s13  }
   0xe   :  { %s277_s16 = smov [#allocation6]  }
   0xf   :  { %s41_s17 = sshll.u32 %s277_s16, 4  ;;  %s42_s17 = int_to_ptr.vmem [resolvable:$true] %s41_s17 }
  0x10   :  { %s236_s18 = scalar_lea.vmem %s42_s17, 512  ;;  %p241_p6 = scmp.lt.s32.totalorder %s42_s17, %s42_s17 }
  0x11   :  { %p237_p5 = scmp.ne.s32.totalorder %s42_s17, %s236_s18  ;;  %p242_p7 = scmp.lt.s32.totalorder %s236_s18, %s236_s18 }
  0x13   :  { %p243_p8 = por %p242_p7, %p241_p6 }
  0x15   :  { %p244_p9 = pnand %p243_p8, %p237_p5 }
  0x17   :  { %247 = shalt.err (!%p244_p9)
}
  0x18   :  { %47 = dma.hbm_to_vmem [thread:$0]  %s311_s1, 512, %s42_s17, [#allocation7], %s275_s12, %s275_s12, %s276_s13  }
  0x19   :  { %268 = dma.done.wait [#allocation4], 512  }
  0x1a   :  { %269 = vsyncadd [#allocation4], 4294966784 }
  0x1b   :  { %270 = dma.done.wait [#allocation7], 512  }
  0x1c   :  { %271 = vsyncadd [#allocation7], 4294966784  ;;  %v75_v0 = vld [vmem:[#allocation6] sm:$0xff]  ;;  %v76_v1 = vld [vmem:[#allocation6 + $0x8] sm:$0xff]  ;;  %vm68_vm0 = vcmask 7168   ;;  %v278_v26 = vmov 0.0  }
  0x1d   :  { %v71_v2 = vld [vmem:[#allocation3] sm:$0xff]  ;;  %v89_v3 = vmul.f32 %v75_v0, %v75_v0  ;;  %v90_v4 = vmul.f32 %v76_v1, %v76_v1  ;;  %v72_v5 = vld [vmem:[#allocation3 + $0x8] sm:$0xff]  ;;  %v77_v7 = vld [vmem:[#allocation6 + $0x10] sm:$0xff]  ;;  %69 = vst.msk [vmem:[#allocation2] sm:$0xff] %vm68_vm0, %v278_v26  ;;  %s279_s0 = smov [#allocation8]  }
  0x1e   :  { %v79_v6 = vmul.f32 %v71_v2, %v71_v2  ;;  %v78_v8 = vld [vmem:[#allocation6 + $0x18] sm:$0xff]  ;;  %v80_v9 = vmul.f32 %v72_v5, %v72_v5  ;;  %v91_v10 = vmul.f32 %v77_v7, %v77_v7  ;;  %v73_v12 = vld [vmem:[#allocation3 + $0x10] sm:$0xff]  ;;  %v99_v22 = vmul.f32 %v75_v0, %v71_v2  ;;  %70 = vst.msk [vmem:[#allocation2 + $0x8] sm:$0xff] %vm68_vm0, %v278_v26  ;;  %s178_s1 = sshll.u32 %s279_s0, 4  ;;  %s179_s1 = int_to_ptr.vmem [resolvable:$true] %s178_s1 }
  0x1f   :  { %v92_v11 = vmul.f32 %v78_v8, %v78_v8  ;;  %v74_v13 = vld [vmem:[#allocation3 + $0x18] sm:$0xff]  ;;  %v93_v14 = vadd.f32 %v90_v4, %v89_v3  ;;  %v81_v15 = vmul.f32 %v73_v12, %v73_v12  ;;  %v101_v19 = vmul.f32 %v77_v7, %v73_v12  ;;  %s248_s23 = scalar_lea.vmem %s179_s1, 128  ;;  %p253_p11 = scmp.lt.s32.totalorder %s179_s1, %s179_s1 }
  0x20   :  { %v82_v16 = vmul.f32 %v74_v13, %v74_v13  ;;  %v83_v17 = vadd.f32 %v80_v9, %v79_v6  ;;  %v102_v20 = vmul.f32 %v78_v8, %v74_v13  ;;  %v100_v23 = vmul.f32 %v76_v1, %v72_v5  ;;  %p249_p10 = scmp.ne.s32.totalorder %s179_s1, %s248_s23  ;;  %p254_p12 = scmp.lt.s32.totalorder %s248_s23, %s248_s23 }
  0x21   :  { %94 = vadd.xlane.f32.xlu1 %v93_v14  ;;  %v96_v18 = vadd.f32 %v92_v11, %v91_v10 }
  0x22   :  { %84 = vadd.xlane.f32.xlu0 %v83_v17  ;;  %v86_v21 = vadd.f32 %v82_v16, %v81_v15  ;;  %v106_v24 = vadd.f32 %v102_v20, %v101_v19  ;;  %v103_v25 = vadd.f32 %v100_v23, %v99_v22  ;;  %p255_p13 = por %p254_p12, %p253_p11 }
  0x24   :  { %v145_v54 = vld [vmem:[#allocation2] sm:$0xff]  ;;  %p256_p0 = pnand %p255_p13, %p249_p10 }
  0x25   :  { %97 = vadd.xlane.f32.xlu1 %v96_v18  ;;  %v146_v60 = vld [vmem:[#allocation2 + $0x8] sm:$0xff] }
  0x26   :  { %87 = vadd.xlane.f32.xlu0 %v86_v21 }
  0x29   :  { %107 = vadd.xlane.f32.xlu1 %v106_v24 }
  0x2a   :  { %104 = vadd.xlane.f32.xlu0 %v103_v25 }
  0xaa   :  { %v95_v27 = vpop.xlane.xlu1 %94 }
  0xab   :  { %v113_v28 = vmax.f32 %v95_v27, 1e-24  ;;  %v85_v29 = vpop.xlane.xlu0 %84 }
  0xac   :  { %v109_v30 = vmax.f32 %v85_v29, 1e-24 }
  0xad   :  { %200 = vrsqrt.f32 %v113_v28 }
  0xae   :  { %202 = vrsqrt.f32 %v109_v30  ;;  %v98_v31 = vpop.xlane.xlu1 %97 }
  0xaf   :  { %v114_v32 = vmax.f32 %v98_v31, 1e-24  ;;  %v88_v33 = vpop.xlane.xlu0 %87 }
  0xb0   :  { %v110_v34 = vmax.f32 %v88_v33, 1e-24 }
  0xb1   :  { %204 = vrsqrt.f32 %v114_v32 }
  0xb2   :  { %206 = vrsqrt.f32 %v110_v34  ;;  %v108_v42 = vpop.xlane.xlu1 %107 }
  0xb3   :  { %v105_v35 = vpop.xlane.xlu0 %104  ;;  %v128_v48 = vmul.f32 2.0, %v108_v42 }
  0xb4   :  { %v127_v41 = vmul.f32 2.0, %v105_v35 }
  0xba   :  { %v201_v36 = vpop.eup %200 }
  0xbb   :  { %v203_v37 = vpop.eup %202  ;;  %v121_v38 = vmul.f32 %v201_v36, %v201_v36 }
  0xbc   :  { %v117_v39 = vmul.f32 %v203_v37, %v203_v37  ;;  %v129_v40 = vmul.f32 %v203_v37, %v201_v36 }
  0xbd   :  { %v123_v43 = vmul.f32 %v121_v38, %v95_v27 }
  0xbe   :  { %v205_v44 = vpop.eup %204  ;;  %v119_v45 = vmul.f32 %v117_v39, %v85_v29  ;;  %v131_v51 = vmul.f32 %v129_v40, %v127_v41 }
  0xbf   :  { %v207_v46 = vpop.eup %206  ;;  %v122_v47 = vmul.f32 %v205_v44, %v205_v44 }
  0xc0   :  { %v125_v49 = vadd.f32 %v123_v43, %v119_v45  ;;  %v118_v50 = vmul.f32 %v207_v46, %v207_v46  ;;  %v130_v52 = vmul.f32 %v207_v46, %v205_v44 }
  0xc1   :  { %v124_v53 = vmul.f32 %v122_v47, %v98_v31 }
  0xc2   :  { %v120_v55 = vmul.f32 %v118_v50, %v88_v33  ;;  %v133_v56 = vsub.f32 %v125_v49, %v131_v51  ;;  %v132_v59 = vmul.f32 %v130_v52, %v128_v48 }
  0xc4   :  { %v126_v57 = vadd.f32 %v124_v53, %v120_v55  ;;  %v147_v58 = vadd.f32 %v145_v54, %v133_v56 }
  0xc6   :  { %150 = vst.msk [vmem:[#allocation2] sm:$0xff] %vm68_vm0, %v147_v58  ;;  %v134_v61 = vsub.f32 %v126_v57, %v132_v59 }
  0xc8   :  { %v148_v62 = vadd.f32 %v146_v60, %v134_v61 }
  0xca   :  { %151 = vst.msk [vmem:[#allocation2 + $0x8] sm:$0xff] %vm68_vm0, %v148_v62 }
  0xcd   :  { %v155_v63 = vld [vmem:[#allocation2] sm:$0xff] }
  0xce   :  { %v157_v1 = vsel %vm68_vm0, %v155_v63, 0.0 }
  0xd1   :  { %v156_v0 = vld [vmem:[#allocation2 + $0x8] sm:$0xff] }
  0xd2   :  { %v158_v2 = vsel %vm68_vm0, %v156_v0, 0.0 }
  0xd3   :  { %v159_v3 = vadd.f32 %v158_v2, %v157_v1 }
  0xd5   :  { %160 = vadd.xlane.f32.xlu0 %v159_v3 }
 0x15e   :  { %v161_v4 = vpop.xlane.xlu0 %160 }
 0x15f   :  { %v162_v5 = vrot.slane %v161_v4, 4 }
 0x161   :  { %v163_v6 = vadd.f32 %v162_v5, %v161_v4 }
 0x163   :  { %v164_v7 = vrot.slane %v163_v6, 2 }
 0x165   :  { %v165_v8 = vadd.f32 %v164_v7, %v163_v6 }
 0x167   :  { %v166_v9 = vrot.slane %v165_v8, 1 }
 0x169   :  { %v167_v10 = vadd.f32 %v166_v9, %v165_v8 }
 0x16b   :  { %192 = vpush %v167_v10 }
 0x19c   :  { %s193_s21 = spop %192 }
 0x19d   :  { %s169_s22 = smul.f32 0.0625, %s193_s21 }
 0x19f   :  { %v170_v11 = vstv %s169_s22 }
 0x1a0   :  { %171 = vst [vmem:[#allocation8] sm:$0xff] %v170_v11 }
 0x1a1   :  { %259 = shalt.err (!%p256_p0)
}
 0x1a2   :  { %181 = dma.vmem_to_hbm [thread:$0]  %s179_s1, 128, %s312_s2, [#allocation5]  }
 0x1a3   :  { %272 = dma.done.wait [#allocation5], 128  }
 0x1a4   :  { %273 = vsyncadd [#allocation5], 4294967168 }
 0x1a5   :  { %185 = vsyncpa [#allocation4], 1 }
 0x1a6   :  { %186 = vsyncpa [#allocation7], 1 }
 0x1a7   :  { %187 = vsyncpa [#allocation5], 1 }

</bundles_post_ra>
